<compile_context>
chip_gen: v6e
topology: v6e:2x2x1
jax: 0.10.0
libtpu: 0.0.40
codegen_flags: <defaults>
</compile_context>

<pallas_src>
import functools

import jax
import jax.numpy as jnp
from jax import lax
from jax.experimental import pallas as pl
from jax.experimental.pallas import tpu as pltpu


def dense_layer_kernel(x_ref, s1_ref, b1_ref, w1_ref, s2_ref, b2_ref,
                       w2_ref, mask_ref, out_ref, im2col_ref, *, width):
    """Fused BN1+ReLU+conv1x1 + BN2+ReLU+conv3x3(pad=1) + cat, one batch elem.

    x_ref     : (1, Cin, HW)     input (NCHW with spatial flattened)
    s1/b1     : (Cin, 1)         folded BN1 scale / bias
    w1_ref    : (Cmid, Cin)      1x1 conv weight (torch OIHW squeezed)
    s2/b2     : (Cmid, 1)        folded BN2 scale / bias
    w2_ref    : (G, 9*Cmid)      3x3 conv weight packed as (g, (dy*3+dx)*Cmid+c)
    mask_ref  : (9, 1, HW)       per-tap zero-padding validity masks
    out_ref   : (1, Cin+G, HW)   [x ; new_features]   (fused torch.cat)
    im2col_ref: (9*Cmid, HW)     VMEM scratch for the im2col slab
    """
    cin = x_ref.shape[1]
    cmid = w1_ref.shape[0]
    hw = x_ref.shape[2]

    x = x_ref[0]                                               # (Cin, HW)

    # torch.cat([x, new_features], dim=1): passthrough channels, lane-dense.
    out_ref[0, :cin, :] = x.astype(out_ref.dtype)

    # BN1 (folded, eval) + ReLU, then 1x1 conv as a single 2D MXU matmul.
    h1 = jnp.maximum(x * s1_ref[...] + b1_ref[...], 0.0)       # (Cin, HW)
    y1 = jnp.dot(w1_ref[...], h1,
                 preferred_element_type=jnp.float32)           # (Cmid, HW)

    # BN2 (folded, eval) + ReLU.
    h2 = jnp.maximum(y1 * s2_ref[...] + b2_ref[...], 0.0)      # (Cmid, HW)

    # im2col over the flattened spatial axis: tap (dy, dx) is a lane roll of
    # h2 by -((dy-1)*W + (dx-1)); pixels whose source lies outside the image
    # (the implicit zero padding) are masked to 0.  Rolls run on the XLU and
    # the slab writes are sublane-aligned (offsets are multiples of Cmid).
    for k in range(9):
        dy, dx = k // 3, k % 3
        off = (dy - 1) * width + (dx - 1)
        tap = h2 if off == 0 else pltpu.roll(h2, shift=(-off) % hw, axis=1)
        im2col_ref[k * cmid:(k + 1) * cmid, :] = tap * mask_ref[k]

    # Fused 3x3 conv: ONE matmul with K = 9*Cmid; result (G, HW) is lane-dense.
    y2 = jnp.dot(w2_ref[...], im2col_ref[...],
                 preferred_element_type=jnp.float32)           # (G, HW)
    out_ref[0, cin:, :] = y2.astype(out_ref.dtype)


@jax.jit
def dense_layer_forward(x_nchw, s1, b1, w1_oihw, s2, b2, w2_oihw):
    """DenseLayer.forward. x_nchw: (N, Cin, H, W) -> (N, Cin + G, H, W)."""
    N, Cin, H, W = x_nchw.shape
    Cmid = w1_oihw.shape[0]            # bn_size * growth_rate
    G = w2_oihw.shape[0]               # growth_rate
    HW = H * W

    # Stay in NCHW; only flatten the spatial dims (a free, contiguous reshape).
    x = x_nchw.reshape(N, Cin, HW).astype(jnp.float32)

    # Weight packing for the kernel.
    w1 = w1_oihw[:, :, 0, 0].astype(jnp.float32)                     # (Cmid, Cin)
    w2 = jnp.transpose(w2_oihw, (0, 2, 3, 1)).reshape(G, 9 * Cmid)   # (G, 9*Cmid)
    w2 = w2.astype(jnp.float32)

    s1k = s1.reshape(Cin, 1).astype(jnp.float32)
    b1k = b1.reshape(Cin, 1).astype(jnp.float32)
    s2k = s2.reshape(Cmid, 1).astype(jnp.float32)
    b2k = b2.reshape(Cmid, 1).astype(jnp.float32)

    # Per-tap validity masks over the flattened spatial axis (zero padding).
    ys = jnp.arange(H)
    xs = jnp.arange(W)
    masks = []
    for dy in range(3):
        row_ok = (ys + dy - 1 >= 0) & (ys + dy - 1 < H)
        for dx in range(3):
            col_ok = (xs + dx - 1 >= 0) & (xs + dx - 1 < W)
            masks.append((row_ok[:, None] & col_ok[None, :]).reshape(1, HW))
    mask = jnp.stack(masks, axis=0).astype(jnp.float32)              # (9, 1, HW)

    kernel = functools.partial(dense_layer_kernel, width=W)

    out = pl.pallas_call(
        kernel,
        out_shape=jax.ShapeDtypeStruct((N, Cin + G, HW), jnp.float32),
        grid_spec=pltpu.PrefetchScalarGridSpec(
            num_scalar_prefetch=0,
            grid=(N,),
            in_specs=[
                pl.BlockSpec((1, Cin, HW), lambda n: (n, 0, 0)),
                pl.BlockSpec((Cin, 1), lambda n: (0, 0)),
                pl.BlockSpec((Cin, 1), lambda n: (0, 0)),
                pl.BlockSpec((Cmid, Cin), lambda n: (0, 0)),
                pl.BlockSpec((Cmid, 1), lambda n: (0, 0)),
                pl.BlockSpec((Cmid, 1), lambda n: (0, 0)),
                pl.BlockSpec((G, 9 * Cmid), lambda n: (0, 0)),
                pl.BlockSpec((9, 1, HW), lambda n: (0, 0, 0)),
            ],
            out_specs=pl.BlockSpec((1, Cin + G, HW), lambda n: (n, 0, 0)),
            scratch_shapes=[pltpu.VMEM((9 * Cmid, HW), jnp.float32)],
        ),
        compiler_params=pltpu.CompilerParams(
            dimension_semantics=("parallel",)),
    )(x, s1k, b1k, w1, s2k, b2k, w2, mask)

    # (N, Cin+G, HW) -> (N, Cin+G, H, W): free reshape, already NCHW.
    return out.reshape(N, Cin + G, H, W)


def dense_layer_reference(x_nchw, s1, b1, w1_oihw, s2, b2, w2_oihw):
    """Pure-JAX reference using lax.conv (NCHW / OIHW)."""
    h1 = jnp.maximum(x_nchw * s1[None, :, None, None]
                     + b1[None, :, None, None], 0.0)
    y1 = lax.conv_general_dilated(h1, w1_oihw, (1, 1), 'VALID',
                                  dimension_numbers=('NCHW', 'OIHW', 'NCHW'))
    h2 = jnp.maximum(y1 * s2[None, :, None, None]
                     + b2[None, :, None, None], 0.0)
    y2 = lax.conv_general_dilated(h2, w2_oihw, (1, 1), ((1, 1), (1, 1)),
                                  dimension_numbers=('NCHW', 'OIHW', 'NCHW'))
    return jnp.concatenate([x_nchw, y2], axis=1)


if __name__ == "__main__":
    # DenseLayer(in_channels=8, growth_rate=8, bn_size=4, drop_rate=0)
    in_channels, growth_rate, bn_size = 8, 8, 4
    mid_channels = bn_size * growth_rate           # 32
    N, H, W = 2, 16, 16
    eps = 1e-5

    key = jax.random.PRNGKey(0)
    keys = jax.random.split(key, 9)

    x = jax.random.normal(keys[0], (N, in_channels, H, W), dtype=jnp.float32)

    # norm1 parameters (eval mode: fold running stats into scale/bias).
    gamma1 = jax.random.uniform(keys[1], (in_channels,), minval=0.5, maxval=1.5)
    beta1 = jax.random.normal(keys[2], (in_channels,)) * 0.1
    mean1 = jax.random.normal(keys[3], (in_channels,)) * 0.1
    var1 = jax.random.uniform(keys[4], (in_channels,), minval=0.5, maxval=1.5)
    scale1 = gamma1 / jnp.sqrt(var1 + eps)
    bias1 = beta1 - mean1 * scale1

    # conv1: (mid, in, 1, 1), no bias.
    w1 = jax.random.normal(keys[5], (mid_channels, in_channels, 1, 1),
                           dtype=jnp.float32) * 0.1

    # norm2 parameters.
    gamma2 = jax.random.uniform(keys[6], (mid_channels,), minval=0.5, maxval=1.5)
    beta2 = jax.random.normal(keys[7], (mid_channels,)) * 0.1
    mean2 = jnp.zeros((mid_channels,), jnp.float32)
    var2 = jnp.ones((mid_channels,), jnp.float32)
    scale2 = gamma2 / jnp.sqrt(var2 + eps)
    bias2 = beta2 - mean2 * scale2

    # conv2: (growth, mid, 3, 3), no bias.
    w2 = jax.random.normal(keys[8], (growth_rate, mid_channels, 3, 3),
                           dtype=jnp.float32) * 0.1

    out = dense_layer_forward(x, scale1, bias1, w1, scale2, bias2, w2)
    out = jax.block_until_ready(out)

    ref = dense_layer_reference(x, scale1, bias1, w1, scale2, bias2, w2)
    assert out.shape == (N, in_channels + growth_rate, H, W), out.shape
    assert jnp.allclose(out, ref, rtol=1e-3, atol=1e-3), \
        float(jnp.max(jnp.abs(out - ref)))

    print("KERNEL_OK")
</pallas_src>

<mosaic_0001>
module attributes {stable_mosaic.version = 11 : i64} {
  func.func @dense_layer_kernel(%arg0: i32, %arg1: memref<1x8x256xf32, #tpu.memory_space<vmem>>, %arg2: memref<8x1xf32, #tpu.memory_space<vmem>>, %arg3: memref<8x1xf32, #tpu.memory_space<vmem>>, %arg4: memref<32x8xf32, #tpu.memory_space<vmem>>, %arg5: memref<32x1xf32, #tpu.memory_space<vmem>>, %arg6: memref<32x1xf32, #tpu.memory_space<vmem>>, %arg7: memref<8x288xf32, #tpu.memory_space<vmem>>, %arg8: memref<9x1x256xf32, #tpu.memory_space<vmem>>, %arg9: memref<1x16x256xf32, #tpu.memory_space<vmem>>, %arg10: memref<288x256xf32, #tpu.memory_space<vmem>>) attributes {dimension_semantics = [#tpu.dimension_semantics<parallel>], iteration_bounds = array<i64: 2>, scalar_prefetch = 0 : i64, scratch_operands = 1 : i64, tpu.core_type = #tpu.core_type<tc>, window_params = [{transform_indices = @transform_0, window_bounds = array<i64: 1, 8, 256>}, {pipeline_mode = #tpu.pipeline_mode<synchronous>, transform_indices = @transform_1, window_bounds = array<i64: 8, 1>}, {pipeline_mode = #tpu.pipeline_mode<synchronous>, transform_indices = @transform_2, window_bounds = array<i64: 8, 1>}, {pipeline_mode = #tpu.pipeline_mode<synchronous>, transform_indices = @transform_3, window_bounds = array<i64: 32, 8>}, {pipeline_mode = #tpu.pipeline_mode<synchronous>, transform_indices = @transform_4, window_bounds = array<i64: 32, 1>}, {pipeline_mode = #tpu.pipeline_mode<synchronous>, transform_indices = @transform_5, window_bounds = array<i64: 32, 1>}, {pipeline_mode = #tpu.pipeline_mode<synchronous>, transform_indices = @transform_6, window_bounds = array<i64: 8, 288>}, {pipeline_mode = #tpu.pipeline_mode<synchronous>, transform_indices = @transform_7, window_bounds = array<i64: 9, 1, 256>}, {transform_indices = @transform_8, window_bounds = array<i64: 1, 16, 256>}]} {
    %c0 = arith.constant 0 : index
    %c0_0 = arith.constant 0 : index
    %c0_1 = arith.constant 0 : index
    %0 = vector.load %arg1[%c0, %c0_0, %c0_1] : memref<1x8x256xf32, #tpu.memory_space<vmem>>, vector<1x8x256xf32>
    %1 = vector.shape_cast %0 : vector<1x8x256xf32> to vector<8x256xf32>
    %c0_2 = arith.constant 0 : index
    %c0_3 = arith.constant 0 : index
    %c0_4 = arith.constant 0 : index
    %2 = vector.load %arg9[%c0_2, %c0_3, %c0_4] : memref<1x16x256xf32, #tpu.memory_space<vmem>>, vector<1x8x256xf32>
    %3 = vector.shape_cast %2 : vector<1x8x256xf32> to vector<8x256xf32>
    %4 = vector.shape_cast %1 : vector<8x256xf32> to vector<1x8x256xf32>
    tpu.vector_store %arg9[%c0_2, %c0_3, %c0_4], %4 {strides = array<i32>} : memref<1x16x256xf32, #tpu.memory_space<vmem>>, vector<1x8x256xf32>,
    %c0_5 = arith.constant 0 : index
    %c0_6 = arith.constant 0 : index
    %5 = vector.load %arg2[%c0_5, %c0_6] : memref<8x1xf32, #tpu.memory_space<vmem>>, vector<8x1xf32>
    %6 = vector.broadcast %5 : vector<8x1xf32> to vector<8x256xf32>
    %7 = arith.mulf %1, %6 : vector<8x256xf32>
    %c0_7 = arith.constant 0 : index
    %c0_8 = arith.constant 0 : index
    %8 = vector.load %arg3[%c0_7, %c0_8] : memref<8x1xf32, #tpu.memory_space<vmem>>, vector<8x1xf32>
    %9 = vector.broadcast %8 : vector<8x1xf32> to vector<8x256xf32>
    %10 = arith.addf %7, %9 : vector<8x256xf32>
    %cst = arith.constant 0.000000e+00 : f32
    %11 = vector.broadcast %cst : f32 to vector<8x256xf32>
    %12 = arith.maximumf %10, %11 : vector<8x256xf32>
    %c0_9 = arith.constant 0 : index
    %c0_10 = arith.constant 0 : index
    %13 = vector.load %arg4[%c0_9, %c0_10] : memref<32x8xf32, #tpu.memory_space<vmem>>, vector<32x8xf32>
    %cst_11 = arith.constant dense<0.000000e+00> : vector<32x256xf32>
    %14 = tpu.matmul %13, %12, %cst_11 {dimension_numbers = #tpu.dot_dimension_numbers<[1], [0], [0], [1], [0, 0, 1, 1], [], []>} : vector<32x8xf32>, vector<8x256xf32>, vector<32x256xf32> -> vector<32x256xf32>
    %c0_12 = arith.constant 0 : index
    %c0_13 = arith.constant 0 : index
    %15 = vector.load %arg5[%c0_12, %c0_13] : memref<32x1xf32, #tpu.memory_space<vmem>>, vector<32x1xf32>
    %16 = vector.broadcast %15 : vector<32x1xf32> to vector<32x256xf32>
    %17 = arith.mulf %14, %16 : vector<32x256xf32>
    %c0_14 = arith.constant 0 : index
    %c0_15 = arith.constant 0 : index
    %18 = vector.load %arg6[%c0_14, %c0_15] : memref<32x1xf32, #tpu.memory_space<vmem>>, vector<32x1xf32>
    %19 = vector.broadcast %18 : vector<32x1xf32> to vector<32x256xf32>
    %20 = arith.addf %17, %19 : vector<32x256xf32>
    %cst_16 = arith.constant 0.000000e+00 : f32
    %21 = vector.broadcast %cst_16 : f32 to vector<32x256xf32>
    %22 = arith.maximumf %20, %21 : vector<32x256xf32>
    %c17_i32 = arith.constant 17 : i32
    %23 = tpu.dynamic_rotate %22 by %c17_i32 dim 1 : vector<32x256xf32>, i32 -> vector<32x256xf32>
    %c0_17 = arith.constant 0 : index
    %c0_18 = arith.constant 0 : index
    %c0_19 = arith.constant 0 : index
    %24 = vector.load %arg8[%c0_17, %c0_18, %c0_19] : memref<9x1x256xf32, #tpu.memory_space<vmem>>, vector<1x1x256xf32>
    %25 = vector.shape_cast %24 : vector<1x1x256xf32> to vector<1x256xf32>
    %26 = vector.broadcast %25 : vector<1x256xf32> to vector<32x256xf32>
    %27 = arith.mulf %23, %26 : vector<32x256xf32>
    %c0_20 = arith.constant 0 : index
    %c0_21 = arith.constant 0 : index
    %28 = vector.load %arg10[%c0_20, %c0_21] : memref<288x256xf32, #tpu.memory_space<vmem>>, vector<32x256xf32>
    tpu.vector_store %arg10[%c0_20, %c0_21], %27 {strides = array<i32>} : memref<288x256xf32, #tpu.memory_space<vmem>>, vector<32x256xf32>,
    %c16_i32 = arith.constant 16 : i32
    %29 = tpu.dynamic_rotate %22 by %c16_i32 dim 1 : vector<32x256xf32>, i32 -> vector<32x256xf32>
    %c1 = arith.constant 1 : index
    %c0_22 = arith.constant 0 : index
    %c0_23 = arith.constant 0 : index
    %30 = vector.load %arg8[%c1, %c0_22, %c0_23] : memref<9x1x256xf32, #tpu.memory_space<vmem>>, vector<1x1x256xf32>
    %31 = vector.shape_cast %30 : vector<1x1x256xf32> to vector<1x256xf32>
    %32 = vector.broadcast %31 : vector<1x256xf32> to vector<32x256xf32>
    %33 = arith.mulf %29, %32 : vector<32x256xf32>
    %c32 = arith.constant 32 : index
    %c0_24 = arith.constant 0 : index
    %34 = vector.load %arg10[%c32, %c0_24] : memref<288x256xf32, #tpu.memory_space<vmem>>, vector<32x256xf32>
    tpu.vector_store %arg10[%c32, %c0_24], %33 {strides = array<i32>} : memref<288x256xf32, #tpu.memory_space<vmem>>, vector<32x256xf32>,
    %c15_i32 = arith.constant 15 : i32
    %35 = tpu.dynamic_rotate %22 by %c15_i32 dim 1 : vector<32x256xf32>, i32 -> vector<32x256xf32>
    %c2 = arith.constant 2 : index
    %c0_25 = arith.constant 0 : index
    %c0_26 = arith.constant 0 : index
    %36 = vector.load %arg8[%c2, %c0_25, %c0_26] : memref<9x1x256xf32, #tpu.memory_space<vmem>>, vector<1x1x256xf32>
    %37 = vector.shape_cast %36 : vector<1x1x256xf32> to vector<1x256xf32>
    %38 = vector.broadcast %37 : vector<1x256xf32> to vector<32x256xf32>
    %39 = arith.mulf %35, %38 : vector<32x256xf32>
    %c64 = arith.constant 64 : index
    %c0_27 = arith.constant 0 : index
    %40 = vector.load %arg10[%c64, %c0_27] : memref<288x256xf32, #tpu.memory_space<vmem>>, vector<32x256xf32>
    tpu.vector_store %arg10[%c64, %c0_27], %39 {strides = array<i32>} : memref<288x256xf32, #tpu.memory_space<vmem>>, vector<32x256xf32>,
    %c1_i32 = arith.constant 1 : i32
    %41 = tpu.dynamic_rotate %22 by %c1_i32 dim 1 : vector<32x256xf32>, i32 -> vector<32x256xf32>
    %c3 = arith.constant 3 : index
    %c0_28 = arith.constant 0 : index
    %c0_29 = arith.constant 0 : index
    %42 = vector.load %arg8[%c3, %c0_28, %c0_29] : memref<9x1x256xf32, #tpu.memory_space<vmem>>, vector<1x1x256xf32>
    %43 = vector.shape_cast %42 : vector<1x1x256xf32> to vector<1x256xf32>
    %44 = vector.broadcast %43 : vector<1x256xf32> to vector<32x256xf32>
    %45 = arith.mulf %41, %44 : vector<32x256xf32>
    %c96 = arith.constant 96 : index
    %c0_30 = arith.constant 0 : index
    %46 = vector.load %arg10[%c96, %c0_30] : memref<288x256xf32, #tpu.memory_space<vmem>>, vector<32x256xf32>
    tpu.vector_store %arg10[%c96, %c0_30], %45 {strides = array<i32>} : memref<288x256xf32, #tpu.memory_space<vmem>>, vector<32x256xf32>,
    %c4 = arith.constant 4 : index
    %c0_31 = arith.constant 0 : index
    %c0_32 = arith.constant 0 : index
    %47 = vector.load %arg8[%c4, %c0_31, %c0_32] : memref<9x1x256xf32, #tpu.memory_space<vmem>>, vector<1x1x256xf32>
    %48 = vector.shape_cast %47 : vector<1x1x256xf32> to vector<1x256xf32>
    %49 = vector.broadcast %48 : vector<1x256xf32> to vector<32x256xf32>
    %50 = arith.mulf %22, %49 : vector<32x256xf32>
    %c128 = arith.constant 128 : index
    %c0_33 = arith.constant 0 : index
    %51 = vector.load %arg10[%c128, %c0_33] : memref<288x256xf32, #tpu.memory_space<vmem>>, vector<32x256xf32>
    tpu.vector_store %arg10[%c128, %c0_33], %50 {strides = array<i32>} : memref<288x256xf32, #tpu.memory_space<vmem>>, vector<32x256xf32>,
    %c255_i32 = arith.constant 255 : i32
    %52 = tpu.dynamic_rotate %22 by %c255_i32 dim 1 : vector<32x256xf32>, i32 -> vector<32x256xf32>
    %c5 = arith.constant 5 : index
    %c0_34 = arith.constant 0 : index
    %c0_35 = arith.constant 0 : index
    %53 = vector.load %arg8[%c5, %c0_34, %c0_35] : memref<9x1x256xf32, #tpu.memory_space<vmem>>, vector<1x1x256xf32>
    %54 = vector.shape_cast %53 : vector<1x1x256xf32> to vector<1x256xf32>
    %55 = vector.broadcast %54 : vector<1x256xf32> to vector<32x256xf32>
    %56 = arith.mulf %52, %55 : vector<32x256xf32>
    %c160 = arith.constant 160 : index
    %c0_36 = arith.constant 0 : index
    %57 = vector.load %arg10[%c160, %c0_36] : memref<288x256xf32, #tpu.memory_space<vmem>>, vector<32x256xf32>
    tpu.vector_store %arg10[%c160, %c0_36], %56 {strides = array<i32>} : memref<288x256xf32, #tpu.memory_space<vmem>>, vector<32x256xf32>,
    %c241_i32 = arith.constant 241 : i32
    %58 = tpu.dynamic_rotate %22 by %c241_i32 dim 1 : vector<32x256xf32>, i32 -> vector<32x256xf32>
    %c6 = arith.constant 6 : index
    %c0_37 = arith.constant 0 : index
    %c0_38 = arith.constant 0 : index
    %59 = vector.load %arg8[%c6, %c0_37, %c0_38] : memref<9x1x256xf32, #tpu.memory_space<vmem>>, vector<1x1x256xf32>
    %60 = vector.shape_cast %59 : vector<1x1x256xf32> to vector<1x256xf32>
    %61 = vector.broadcast %60 : vector<1x256xf32> to vector<32x256xf32>
    %62 = arith.mulf %58, %61 : vector<32x256xf32>
    %c192 = arith.constant 192 : index
    %c0_39 = arith.constant 0 : index
    %63 = vector.load %arg10[%c192, %c0_39] : memref<288x256xf32, #tpu.memory_space<vmem>>, vector<32x256xf32>
    tpu.vector_store %arg10[%c192, %c0_39], %62 {strides = array<i32>} : memref<288x256xf32, #tpu.memory_space<vmem>>, vector<32x256xf32>,
    %c240_i32 = arith.constant 240 : i32
    %64 = tpu.dynamic_rotate %22 by %c240_i32 dim 1 : vector<32x256xf32>, i32 -> vector<32x256xf32>
    %c7 = arith.constant 7 : index
    %c0_40 = arith.constant 0 : index
    %c0_41 = arith.constant 0 : index
    %65 = vector.load %arg8[%c7, %c0_40, %c0_41] : memref<9x1x256xf32, #tpu.memory_space<vmem>>, vector<1x1x256xf32>
    %66 = vector.shape_cast %65 : vector<1x1x256xf32> to vector<1x256xf32>
    %67 = vector.broadcast %66 : vector<1x256xf32> to vector<32x256xf32>
    %68 = arith.mulf %64, %67 : vector<32x256xf32>
    %c224 = arith.constant 224 : index
    %c0_42 = arith.constant 0 : index
    %69 = vector.load %arg10[%c224, %c0_42] : memref<288x256xf32, #tpu.memory_space<vmem>>, vector<32x256xf32>
    tpu.vector_store %arg10[%c224, %c0_42], %68 {strides = array<i32>} : memref<288x256xf32, #tpu.memory_space<vmem>>, vector<32x256xf32>,
    %c239_i32 = arith.constant 239 : i32
    %70 = tpu.dynamic_rotate %22 by %c239_i32 dim 1 : vector<32x256xf32>, i32 -> vector<32x256xf32>
    %c8 = arith.constant 8 : index
    %c0_43 = arith.constant 0 : index
    %c0_44 = arith.constant 0 : index
    %71 = vector.load %arg8[%c8, %c0_43, %c0_44] : memref<9x1x256xf32, #tpu.memory_space<vmem>>, vector<1x1x256xf32>
    %72 = vector.shape_cast %71 : vector<1x1x256xf32> to vector<1x256xf32>
    %73 = vector.broadcast %72 : vector<1x256xf32> to vector<32x256xf32>
    %74 = arith.mulf %70, %73 : vector<32x256xf32>
    %c256 = arith.constant 256 : index
    %c0_45 = arith.constant 0 : index
    %75 = vector.load %arg10[%c256, %c0_45] : memref<288x256xf32, #tpu.memory_space<vmem>>, vector<32x256xf32>
    tpu.vector_store %arg10[%c256, %c0_45], %74 {strides = array<i32>} : memref<288x256xf32, #tpu.memory_space<vmem>>, vector<32x256xf32>,
    %c0_46 = arith.constant 0 : index
    %c0_47 = arith.constant 0 : index
    %76 = vector.load %arg7[%c0_46, %c0_47] : memref<8x288xf32, #tpu.memory_space<vmem>>, vector<8x288xf32>
    %c0_48 = arith.constant 0 : index
    %c0_49 = arith.constant 0 : index
    %77 = vector.load %arg10[%c0_48, %c0_49] : memref<288x256xf32, #tpu.memory_space<vmem>>, vector<288x256xf32>
    %cst_50 = arith.constant dense<0.000000e+00> : vector<8x256xf32>
    %78 = tpu.matmul %76, %77, %cst_50 {dimension_numbers = #tpu.dot_dimension_numbers<[1], [0], [0], [1], [0, 0, 1, 1], [], []>} : vector<8x288xf32>, vector<288x256xf32>, vector<8x256xf32> -> vector<8x256xf32>
    %c0_51 = arith.constant 0 : index
    %c8_52 = arith.constant 8 : index
    %c0_53 = arith.constant 0 : index
    %79 = vector.load %arg9[%c0_51, %c8_52, %c0_53] : memref<1x16x256xf32, #tpu.memory_space<vmem>>, vector<1x8x256xf32>
    %80 = vector.shape_cast %79 : vector<1x8x256xf32> to vector<8x256xf32>
    %81 = vector.shape_cast %78 : vector<8x256xf32> to vector<1x8x256xf32>
    tpu.vector_store %arg9[%c0_51, %c8_52, %c0_53], %81 {strides = array<i32>} : memref<1x16x256xf32, #tpu.memory_space<vmem>>, vector<1x8x256xf32>,
    return
  }
  func.func @transform_0(%arg0: i32) -> (i32, i32, i32) {
    %c0_i32 = arith.constant 0 : i32
    %c0_i32_0 = arith.constant 0 : i32
    %c0_i32_1 = arith.constant 0 : i32
    return %arg0, %c0_i32, %c0_i32_0 : i32, i32, i32
  }
  func.func @transform_1(%arg0: i32) -> (i32, i32) {
    %c0_i32 = arith.constant 0 : i32
    %c0_i32_0 = arith.constant 0 : i32
    %c0_i32_1 = arith.constant 0 : i32
    return %c0_i32, %c0_i32_0 : i32, i32
  }
  func.func @transform_2(%arg0: i32) -> (i32, i32) {
    %c0_i32 = arith.constant 0 : i32
    %c0_i32_0 = arith.constant 0 : i32
    %c0_i32_1 = arith.constant 0 : i32
    return %c0_i32, %c0_i32_0 : i32, i32
  }
  func.func @transform_3(%arg0: i32) -> (i32, i32) {
    %c0_i32 = arith.constant 0 : i32
    %c0_i32_0 = arith.constant 0 : i32
    %c0_i32_1 = arith.constant 0 : i32
    return %c0_i32, %c0_i32_0 : i32, i32
  }
  func.func @transform_4(%arg0: i32) -> (i32, i32) {
    %c0_i32 = arith.constant 0 : i32
    %c0_i32_0 = arith.constant 0 : i32
    %c0_i32_1 = arith.constant 0 : i32
    return %c0_i32, %c0_i32_0 : i32, i32
  }
  func.func @transform_5(%arg0: i32) -> (i32, i32) {
    %c0_i32 = arith.constant 0 : i32
    %c0_i32_0 = arith.constant 0 : i32
    %c0_i32_1 = arith.constant 0 : i32
    return %c0_i32, %c0_i32_0 : i32, i32
  }
  func.func @transform_6(%arg0: i32) -> (i32, i32) {
    %c0_i32 = arith.constant 0 : i32
    %c0_i32_0 = arith.constant 0 : i32
    %c0_i32_1 = arith.constant 0 : i32
    return %c0_i32, %c0_i32_0 : i32, i32
  }
  func.func @transform_7(%arg0: i32) -> (i32, i32, i32) {
    %c0_i32 = arith.constant 0 : i32
    %c0_i32_0 = arith.constant 0 : i32
    %c0_i32_1 = arith.constant 0 : i32
    %c0_i32_2 = arith.constant 0 : i32
    return %c0_i32, %c0_i32_0, %c0_i32_1 : i32, i32, i32
  }
  func.func @transform_8(%arg0: i32) -> (i32, i32, i32) {
    %c0_i32 = arith.constant 0 : i32
    %c0_i32_0 = arith.constant 0 : i32
    %c0_i32_1 = arith.constant 0 : i32
    return %arg0, %c0_i32, %c0_i32_0 : i32, i32, i32
  }
}

</mosaic_0001>

<bundles_post_ra>
// kernel: dense_layer_forward.1
= control target key start
LH: loop header
LB: loop body
LE: loop exit
PB: predicated region body
PF: predicated region fallthrough
CT: control target
= control target key end

     0   :  { %s1355_s27 = smov 0   ;;  %s1862_s0 = inlined_call_operand.vmem [shape: f32[2,8,256], index: 0, kind: input, shape index: {}]   ;;  %s1863_s1 = inlined_call_operand.vmem [shape: f32[8,1], index: 1, kind: input, shape index: {}]   ;;  %s1864_s2 = inlined_call_operand.vmem [shape: f32[8,1], index: 2, kind: input, shape index: {}]   ;;  %s1865_s3 = inlined_call_operand.vmem [shape: f32[32,8], index: 3, kind: input, shape index: {}]   ;;  %s1866_s4 = inlined_call_operand.vmem [shape: f32[32,1], index: 4, kind: input, shape index: {}]   ;;  %s1867_s5 = inlined_call_operand.vmem [shape: f32[32,1], index: 5, kind: input, shape index: {}]   ;;  %s1868_s6 = inlined_call_operand.vmem [shape: f32[8,288], index: 6, kind: input, shape index: {}]   ;;  %s1869_s7 = inlined_call_operand.vmem [shape: f32[9,1,256], index: 7, kind: input, shape index: {}]   ;;  %s1870_s8 = inlined_call_operand.vmem [shape: f32[2,16,256], index: 8, kind: output, shape index: {}]  }
   0x1 LB: > { %s1246_s28 = sadd.s32 4294967295, %s1298_s27   ;;  %p1250_p0 = scmp.ge.s32.totalorder %s1298_s27, 1  ;;  %s1298_s27 = sphi %s1355_s27, %s18_s27  }
   0x2   : > { %p262_p1 = scmp.lt.s32.totalorder %s1298_s27, 3 }
   0x4   : > { %p263_p2 = pnand %p1250_p0, %p262_p1 }
   0x5   : > { %p296_p3 = scmp.lt.s32.totalorder (!%p263_p2), %s1246_s28, 1  ;;  %s1302_s23 = smov (!%p263_p2), 1  }
   0x6   : > { %266 = sbr.rel (%p263_p2) target bundleno = 790 (0x316), region = 52  ;;  %s1303_s24 = smov (!%p263_p2), 15  }
   0x7   : > { %s1304_s25 = smov (!%p263_p2), 16   ;;  %s1305_s26 = smov (!%p263_p2), 17  }
   0x8   : > { %s1307_s29 = smov (!%p263_p2), 113   ;;  %s1308_s30 = smov (!%p263_p2), 127  }
   0x9   : > { %s1309_s9 = smov (!%p263_p2), 111  }
   0xb   : > { %v310_v0 = vld [vmem:[%s1863_s1] sm:$0xff]  ;;  %v1300_v1 = vmov 0   ;;  %s1872_s28 = smov (!%p296_p3, %s1246_s28), 1  ;;  %v469_v5 = vld [vmem:[%s1867_s5 + $0x18] sm:$0xff]  ;;  %v1301_v6 = vmov 0.0   ;;  %v468_v7 = vld [vmem:[%s1867_s5 + $0x10] sm:$0xff] }
   0xc   : > { %1290 = vset.pattern.permute.xlu0 %v1300_v1  ;;  %1291 = vset.pattern.permute.xlu1 %v1300_v1  ;;  %v318_v2 = vld [vmem:[%s1864_s2] sm:$0xff]  ;;  %s1270_s11 = sshll.u32 %s1872_s28, 4  ;;  %s1271_s12 = sshll.u32 %s1872_s28, 5  ;;  %v467_v8 = vld [vmem:[%s1867_s5 + $0x8] sm:$0xff]  ;;  %v437_v9 = vld [vmem:[%s1866_s4 + $0x18] sm:$0xff]  ;;  %vm332_vm0 = vcmask 64512  }
   0xd   : > { %313 = vperm.xlu0 %1290, %v310_v0   ;;  %s300_s15 = scalar_lea.vmem %s1862_s0, %s1270_s11  ;;  %s1375_s18 = scalar_lea.vmem %s1870_s8, %s1271_s12  ;;  %409 = vmatprep.mubr.f32.mxu0 %v1301_v6  ;;  %v436_v10 = vld [vmem:[%s1866_s4 + $0x10] sm:$0xff]  ;;  %v435_v11 = vld [vmem:[%s1866_s4 + $0x8] sm:$0xff]  ;;  %v434_v12 = vld [vmem:[%s1866_s4] sm:$0xff]  ;;  %vm1043_vm9 = vcmask 261120  }
   0xe   : > { %v306_v3 = vld [vmem:[%s300_s15] sm:$0xff]  ;;  %v307_v4 = vld [vmem:[%s300_s15 + $0x8] sm:$0xff]  ;;  %455 = vperm.xlu1 %1291, %v437_v9   ;;  %v330_v24 = vld [vmem:[%s1865_s3 + $0x10] sm:$0xff]  ;;  %s1306_s28 = smov 112  }
   0xf   : > { %308 = vst [vmem:[%s1375_s18] sm:$0xff] %v306_v3  ;;  %309 = vst [vmem:[%s1375_s18 + $0x8] sm:$0xff] %v307_v4  ;;  %v466_v13 = vld [vmem:[%s1867_s5] sm:$0xff]  ;;  %v329_v23 = vld [vmem:[%s1865_s3 + $0x8] sm:$0xff] }
  0x10   : > { %v328_v22 = vld [vmem:[%s1865_s3] sm:$0xff]  ;;  %v331_v25 = vld [vmem:[%s1865_s3 + $0x18] sm:$0xff] }
  0x11   : > { %321 = vperm.xlu0 %1290, %v318_v2   ;;  %v522_v2 = vlaneseq }
  0x12   : > { %450 = vperm.xlu1 %1291, %v436_v10  }
  0x15   : > { %487 = vperm.xlu0 %1290, %v469_v5   ;;  %v969_v5 = vld [vmem:[%s1868_s6 + $0x8] sm:$0xff] }
  0x16   : > { %445 = vperm.xlu1 %1291, %v435_v11   ;;  %1111 = vmatprep.mubr.f32.mxu1 %v969_v5 }
  0x19   : > { %482 = vperm.xlu0 %1290, %v468_v7  }
  0x1a   : > { %440 = vperm.xlu1 %1291, %v434_v12  }
  0x1d   : > { %477 = vperm.xlu0 %1290, %v467_v8  }
  0x1e   : > { %472 = vperm.xlu1 %1291, %v466_v13  }
  0x88   : > { %v314_v14 = vpop.permute.xlu0 %313 }
  0x89   : > { %v316_v15 = vmul.f32 %v314_v14, %v306_v3  ;;  %v317_v16 = vmul.f32 %v314_v14, %v307_v4  ;;  %v1415_v26 = vpop.permute.xlu1 %455  ;;  %v1531_v3 = vand.u32 127, %v522_v2 }
  0x8b   : > { %vm685_vm1 = vcmp.lt.s32.totalorder %v1531_v3, 1  ;;  %vm631_vm2 = vcmp.lt.s32.totalorder %v1531_v3, 15  ;;  %vm577_vm3 = vcmp.lt.s32.totalorder %v1531_v3, 16  ;;  %vm524_vm4 = vcmp.lt.s32.totalorder %v1531_v3, 17 }
  0x8c   : > { %v322_v17 = vpop.permute.xlu0 %321  ;;  %vm876_vm5 = vcmp.lt.s32.totalorder %v1531_v3, 112  ;;  %vm822_vm6 = vcmp.lt.s32.totalorder %v1531_v3, 113  ;;  %vm768_vm7 = vcmp.lt.s32.totalorder %v1531_v3, 127  ;;  %vm930_vm8 = vcmp.lt.s32.totalorder %v1531_v3, 111 }
  0x8d   : > { %v324_v18 = vadd.f32 %v322_v17, %v316_v15  ;;  %v325_v19 = vadd.f32 %v322_v17, %v317_v16  ;;  %v451_v27 = vpop.permute.xlu1 %450 }
  0x8f   : > { %v327_v20 = vmax.f32 %v325_v19, 0.0  ;;  %v326_v21 = vmax.f32 %v324_v18, 0.0 }
  0x90   : > { %v488_v39 = vpop.permute.xlu0 %487 }
  0x91   : > { %375 = vmatprep.subr.mxu0 %v327_v20  ;;  %v446_v28 = vpop.permute.xlu1 %445 }
  0x92   : > { %376 = vmatpush1.msra.mxu0 %v326_v21 }
  0x93   : > { %1255 = vmatmul.mubr.msk.f32.vlgmr.msra.gmra.mxu0 %vm332_vm0, %v328_v22 }
  0x94   : > { %415 = vmatprep.mubr.f32.mxu0 %v1301_v6  ;;  %v483_v41 = vpop.permute.xlu0 %482 }
  0x95   : > { %v441_v29 = vpop.permute.xlu1 %440 }
  0x97   : > { %1256 = vmatmul.mubr.msk.f32.gmra.mxu0 %vm332_vm0, %v329_v23 }
  0x98   : > { %421 = vmatprep.mubr.f32.mxu0 %v1301_v6  ;;  %v478_v45 = vpop.permute.xlu0 %477 }
  0x99   : > { %v473_v32 = vpop.permute.xlu1 %472 }
  0x9b   : > { %1257 = vmatmul.mubr.msk.f32.gmra.mxu0 %vm332_vm0, %v330_v24 }
  0x9c   : > { %427 = vmatprep.mubr.f32.mxu0 %v1301_v6 }
  0x9f   : > { %1258 = vmatmul.mubr.msk.f32.gmra.mxu0 %vm332_vm0, %v331_v25 }
  0xa0   : > { %1182 = vmatprep.mubr.f32.mxu0 %v1301_v6 }
 0x153   : > { %v411_v30 = vpop.f32.mrf.mxu0 }
 0x154   : > { %v458_v31 = vmul.f32 %v441_v29, %v411_v30 }
 0x155   : > { %v413_v33 = vpop.f32.mrf.mxu0 }
 0x156   : > { %v490_v34 = vadd.f32 %v473_v32, %v458_v31  ;;  %v459_v35 = vmul.f32 %v441_v29, %v413_v33 }
 0x157   : > { %v417_v40 = vpop.f32.mrf.mxu0 }
 0x158   : > { %v1417_v36 = vmax.f32 %v490_v34, 0.0  ;;  %v491_v37 = vadd.f32 %v473_v32, %v459_v35  ;;  %v460_v43 = vmul.f32 %v446_v28, %v417_v40 }
 0x159   : > { %v419_v42 = vpop.f32.mrf.mxu0 }
 0x15a   : > { %v1419_v38 = vmax.f32 %v491_v37, 0.0  ;;  %669 = vrot.lane.b32.xlu0 %v1417_v36, %s1302_s23  ;;  %v461_v44 = vmul.f32 %v446_v28, %v419_v42  ;;  %v492_v46 = vadd.f32 %v478_v45, %v460_v43 }
 0x15b   : > { %v423_v50 = vpop.f32.mrf.mxu0 }
 0x15c   : > { %677 = vrot.lane.b32.xlu1 %v1419_v38, %s1302_s23  ;;  %v493_v47 = vadd.f32 %v478_v45, %v461_v44  ;;  %v1439_v48 = vmax.f32 %v492_v46, 0.0  ;;  %v462_v52 = vmul.f32 %v451_v27, %v423_v50  ;;  %v536_v45 = vshrl.u32 %v522_v2, 7  ;;  %v1261_v50 = vld [vmem:[%s1869_s7 + $0x6] sm:$0x3] }
 0x15d   : > { %v425_v51 = vpop.f32.mrf.mxu0 }
 0x15e   : > { %615 = vrot.lane.b32.xlu0 %v1417_v36, %s1303_s24  ;;  %v1443_v49 = vmax.f32 %v493_v47, 0.0  ;;  %v463_v53 = vmul.f32 %v451_v27, %v425_v51  ;;  %v494_v54 = vadd.f32 %v483_v41, %v462_v52  ;;  %v1620_v51 = vsub.s32 0, %v536_v45 }
 0x15f   : > { %v429_v58 = vpop.f32.mrf.mxu0  ;;  %v1622_v52 = vsub.s32 1, %v536_v45 }
 0x160   : > { %623 = vrot.lane.b32.xlu1 %v1419_v38, %s1303_s24  ;;  %v495_v55 = vadd.f32 %v483_v41, %v463_v53  ;;  %v1463_v56 = vmax.f32 %v494_v54, 0.0  ;;  %v464_v60 = vmul.f32 %v1415_v26, %v429_v58  ;;  %v700_v54 = vrot.slane %v1261_v50, %v1620_v51 }
 0x161   : > { %v431_v59 = vpop.f32.mrf.mxu0 }
 0x162   : > { %561 = vrot.lane.b32.xlu0 %v1417_v36, %s1304_s25  ;;  %v1467_v57 = vmax.f32 %v495_v55, 0.0  ;;  %v465_v61 = vmul.f32 %v1415_v26, %v431_v59  ;;  %v496_v62 = vadd.f32 %v488_v39, %v464_v60  ;;  %v704_v55 = vrot.slane %v1261_v50, %v1622_v52 }
 0x164   : > { %569 = vrot.lane.b32.xlu1 %v1419_v38, %s1304_s25  ;;  %v497_v63 = vadd.f32 %v488_v39, %v465_v61  ;;  %v1489_v0 = vmax.f32 %v496_v62, 0.0 }
 0x166   : > { %506 = vrot.lane.b32.xlu0 %v1417_v36, %s1305_s26  ;;  %v1493_v1 = vmax.f32 %v497_v63, 0.0 }
 0x168   : > { %514 = vrot.lane.b32.xlu1 %v1419_v38, %s1305_s26 }
 0x16a   : > { %860 = vrot.lane.b32.xlu0 %v1417_v36, %s1306_s28 }
 0x16c   : > { %868 = vrot.lane.b32.xlu1 %v1419_v38, %s1306_s28 }
 0x16e   : > { %671 = vrot.lane.b32.xlu0 %v1439_v48, %s1302_s23 }
 0x170   : > { %679 = vrot.lane.b32.xlu1 %v1443_v49, %s1302_s23 }
 0x172   : > { %617 = vrot.lane.b32.xlu0 %v1439_v48, %s1303_s24 }
 0x174   : > { %625 = vrot.lane.b32.xlu1 %v1443_v49, %s1303_s24 }
 0x176   : > { %563 = vrot.lane.b32.xlu0 %v1439_v48, %s1304_s25 }
 0x178   : > { %571 = vrot.lane.b32.xlu1 %v1443_v49, %s1304_s25 }
 0x17a   : > { %508 = vrot.lane.b32.xlu0 %v1439_v48, %s1305_s26 }
 0x17c   : > { %516 = vrot.lane.b32.xlu1 %v1443_v49, %s1305_s26 }
 0x17e   : > { %862 = vrot.lane.b32.xlu0 %v1439_v48, %s1306_s28 }
 0x180   : > { %870 = vrot.lane.b32.xlu1 %v1443_v49, %s1306_s28 }
 0x182   : > { %673 = vrot.lane.b32.xlu0 %v1463_v56, %s1302_s23 }
 0x184   : > { %681 = vrot.lane.b32.xlu1 %v1467_v57, %s1302_s23 }
 0x186   : > { %619 = vrot.lane.b32.xlu0 %v1463_v56, %s1303_s24 }
 0x188   : > { %627 = vrot.lane.b32.xlu1 %v1467_v57, %s1303_s24 }
 0x18a   : > { %565 = vrot.lane.b32.xlu0 %v1463_v56, %s1304_s25 }
 0x18c   : > { %573 = vrot.lane.b32.xlu1 %v1467_v57, %s1304_s25 }
 0x18e   : > { %510 = vrot.lane.b32.xlu0 %v1463_v56, %s1305_s26 }
 0x190   : > { %518 = vrot.lane.b32.xlu1 %v1467_v57, %s1305_s26 }
 0x192   : > { %864 = vrot.lane.b32.xlu0 %v1463_v56, %s1306_s28 }
 0x194   : > { %872 = vrot.lane.b32.xlu1 %v1467_v57, %s1306_s28 }
 0x196   : > { %675 = vrot.lane.b32.xlu0 %v1489_v0, %s1302_s23 }
 0x198   : > { %683 = vrot.lane.b32.xlu1 %v1493_v1, %s1302_s23 }
 0x19a   : > { %810 = vrot.lane.b32.xlu0 %v1463_v56, %s1307_s29 }
 0x19c   : > { %818 = vrot.lane.b32.xlu1 %v1467_v57, %s1307_s29 }
 0x19e   : > { %621 = vrot.lane.b32.xlu0 %v1489_v0, %s1303_s24 }
 0x1a0   : > { %629 = vrot.lane.b32.xlu1 %v1493_v1, %s1303_s24 }
 0x1a2   : > { %567 = vrot.lane.b32.xlu0 %v1489_v0, %s1304_s25 }
 0x1a4   : > { %816 = vrot.lane.b32.xlu1 %v1443_v49, %s1307_s29 }
 0x1a6   : > { %512 = vrot.lane.b32.xlu0 %v1489_v0, %s1305_s26 }
 0x1a8   : > { %575 = vrot.lane.b32.xlu1 %v1493_v1, %s1304_s25 }
 0x1aa   : > { %866 = vrot.lane.b32.xlu0 %v1489_v0, %s1306_s28 }
 0x1ac   : > { %814 = vrot.lane.b32.xlu1 %v1419_v38, %s1307_s29 }
 0x1ae   : > { %812 = vrot.lane.b32.xlu0 %v1489_v0, %s1307_s29 }
 0x1b0   : > { %520 = vrot.lane.b32.xlu1 %v1493_v1, %s1305_s26 }
 0x1b2   : > { %808 = vrot.lane.b32.xlu0 %v1439_v48, %s1307_s29 }
 0x1b4   : > { %764 = vrot.lane.b32.xlu1 %v1467_v57, %s1308_s30 }
 0x1b6   : > { %806 = vrot.lane.b32.xlu0 %v1417_v36, %s1307_s29 }
 0x1b8   : > { %874 = vrot.lane.b32.xlu1 %v1493_v1, %s1306_s28 }
 0x1ba   : > { %758 = vrot.lane.b32.xlu0 %v1489_v0, %s1308_s30 }
 0x1bc   : > { %762 = vrot.lane.b32.xlu1 %v1443_v49, %s1308_s30 }
 0x1be   : > { %756 = vrot.lane.b32.xlu0 %v1463_v56, %s1308_s30 }
 0x1c0   : > { %820 = vrot.lane.b32.xlu1 %v1493_v1, %s1307_s29 }
 0x1c2   : > { %754 = vrot.lane.b32.xlu0 %v1439_v48, %s1308_s30 }
 0x1c4   : > { %760 = vrot.lane.b32.xlu1 %v1419_v38, %s1308_s30 }
 0x1c6   : > { %752 = vrot.lane.b32.xlu0 %v1417_v36, %s1308_s30 }
 0x1c8   : > { %766 = vrot.lane.b32.xlu1 %v1493_v1, %s1308_s30 }
 0x1ca   : > { %920 = vrot.lane.b32.xlu0 %v1489_v0, %s1309_s9 }
 0x1cc   : > { %v670_v4 = vpop.permute.xlu0 %669  ;;  %926 = vrot.lane.b32.xlu1 %v1467_v57, %s1309_s9 }
 0x1ce   : > { %v678_v6 = vpop.permute.xlu1 %677  ;;  %918 = vrot.lane.b32.xlu0 %v1463_v56, %s1309_s9 }
 0x1cf   : > { %v1542_v7 = vsel %vm685_vm1, %v670_v4, %v678_v6  ;;  %v1546_v8 = vsel %vm685_vm1, %v678_v6, %v670_v4 }
 0x1d0   : > { %v616_v9 = vpop.permute.xlu0 %615  ;;  %928 = vrot.lane.b32.xlu1 %v1493_v1, %s1309_s9 }
 0x1d2   : > { %v624_v10 = vpop.permute.xlu1 %623  ;;  %916 = vrot.lane.b32.xlu0 %v1439_v48, %s1309_s9 }
 0x1d3   : > { %v1553_v11 = vsel %vm631_vm2, %v616_v9, %v624_v10  ;;  %v1557_v12 = vsel %vm631_vm2, %v624_v10, %v616_v9 }
 0x1d4   : > { %v562_v13 = vpop.permute.xlu0 %561  ;;  %924 = vrot.lane.b32.xlu1 %v1443_v49, %s1309_s9 }
 0x1d6   : > { %v570_v14 = vpop.permute.xlu1 %569  ;;  %914 = vrot.lane.b32.xlu0 %v1417_v36, %s1309_s9 }
 0x1d7   : > { %v1564_v15 = vsel %vm577_vm3, %v562_v13, %v570_v14  ;;  %v1568_v16 = vsel %vm577_vm3, %v570_v14, %v562_v13  ;;  %v1260_v13 = vld [vmem:[%s1869_s7 + $0x4] sm:$0x3] }
 0x1d8   : > { %v507_v17 = vpop.permute.xlu0 %506  ;;  %922 = vrot.lane.b32.xlu1 %v1419_v38, %s1309_s9 }
 0x1da   : > { %v515_v18 = vpop.permute.xlu1 %514 }
 0x1db   : > { %v1574_v19 = vsel %vm524_vm4, %v507_v17, %v515_v18  ;;  %v1578_v20 = vsel %vm524_vm4, %v515_v18, %v507_v17 }
 0x1dc   : > { %v861_v21 = vpop.permute.xlu0 %860 }
 0x1de   : > { %v869_v22 = vpop.permute.xlu1 %868 }
 0x1df   : > { %v1583_v23 = vsel %vm876_vm5, %v861_v21, %v869_v22  ;;  %v1587_v24 = vsel %vm876_vm5, %v869_v22, %v861_v21  ;;  %v708_v22 = vmul.f32 %v704_v55, %v1542_v7 }
 0x1e0   : > { %v672_v25 = vpop.permute.xlu0 %671 }
 0x1e2   : > { %v680_v26 = vpop.permute.xlu1 %679 }
 0x1e3   : > { %v687_v5 = vsel %vm685_vm1, %v672_v25, %v680_v26  ;;  %v691_v6 = vsel %vm685_vm1, %v680_v26, %v672_v25  ;;  %v650_v25 = vrot.slane %v1260_v13, %v1622_v52 }
 0x1e4   : > { %v1589_v27 = vpop.permute.xlu0 %617  ;;  %v710_v17 = vmul.f32 %v704_v55, %v687_v5  ;;  %v709_v21 = vmul.f32 %v700_v54, %v691_v6 }
 0x1e5   : > { %v654_v5 = vmul.f32 %v650_v25, %v1553_v11 }
 0x1e6   : > { %v1591_v28 = vpop.permute.xlu1 %625 }
 0x1e8   : > { %v1593_v29 = vpop.permute.xlu0 %563 }
 0x1ea   : > { %v1595_v30 = vpop.permute.xlu1 %571 }
 0x1ec   : > { %v1597_v31 = vpop.permute.xlu0 %508 }
 0x1ee   : > { %v1599_v32 = vpop.permute.xlu1 %516 }
 0x1f0   : > { %v1601_v33 = vpop.permute.xlu0 %862 }
 0x1f2   : > { %v1603_v34 = vpop.permute.xlu1 %870 }
 0x1f4   : > { %v674_v35 = vpop.permute.xlu0 %673 }
 0x1f6   : > { %v682_v37 = vpop.permute.xlu1 %681 }
 0x1f7   : > { %v688_v59 = vsel %vm685_vm1, %v674_v35, %v682_v37  ;;  %v692_v62 = vsel %vm685_vm1, %v682_v37, %v674_v35  ;;  %v646_v35 = vrot.slane %v1260_v13, %v1620_v51  ;;  %v707_v37 = vmul.f32 %v700_v54, %v1546_v8 }
 0x1f8   : > { %v620_v39 = vpop.permute.xlu0 %619  ;;  %v712_v9 = vmul.f32 %v704_v55, %v688_v59  ;;  %v711_v14 = vmul.f32 %v700_v54, %v692_v62  ;;  %v633_v8 = vsel %vm631_vm2, %v1589_v27, %v1591_v28 }
 0x1f9   : > { %v656_v62 = vmul.f32 %v650_v25, %v633_v8 }
 0x1fa   : > { %v628_v40 = vpop.permute.xlu1 %627 }
 0x1fb   : > { %v634_v45 = vsel %vm631_vm2, %v620_v39, %v628_v40  ;;  %v638_v7 = vsel %vm631_vm2, %v628_v40, %v620_v39  ;;  %v1259_v39 = vld [vmem:[%s1869_s7 + $0x2] sm:$0x3] }
 0x1fc   : > { %v1605_v41 = vpop.permute.xlu0 %565  ;;  %v657_v40 = vmul.f32 %v646_v35, %v638_v7  ;;  %v592_v6 = vrot.slane %v1259_v39, %v1620_v51 }
 0x1fe   : > { %v1607_v42 = vpop.permute.xlu1 %573 }
 0x1ff   : > { %v580_v13 = vsel %vm577_vm3, %v1605_v41, %v1607_v42  ;;  %v584_v11 = vsel %vm577_vm3, %v1607_v42, %v1605_v41  ;;  %v533_v41 = vld [vmem:[%s1869_s7] sm:$0x3] }
 0x200   : > { %v1609_v43 = vpop.permute.xlu0 %510  ;;  %v603_v42 = vmul.f32 %v592_v6, %v584_v11 }
 0x202   : > { %v1611_v44 = vpop.permute.xlu1 %518 }
 0x204   : > { %v1613_v46 = vpop.permute.xlu0 %864 }
 0x206   : > { %v1615_v47 = vpop.permute.xlu1 %872 }
 0x208   : > { %v676_v53 = vpop.permute.xlu0 %675 }
 0x20a   : > { %v684_v58 = vpop.permute.xlu1 %683 }
 0x20b   : > { %v693_v60 = vsel %vm685_vm1, %v684_v58, %v676_v53  ;;  %v689_v61 = vsel %vm685_vm1, %v676_v53, %v684_v58 }
 0x20c   : > { %v1634_v63 = vpop.permute.xlu0 %810  ;;  %v714_v2 = vmul.f32 %v704_v55, %v689_v61  ;;  %v713_v4 = vmul.f32 %v700_v54, %v693_v60  ;;  %v637_v54 = vsel %vm631_vm2, %v1591_v28, %v1589_v27  ;;  %v658_v60 = vmul.f32 %v650_v25, %v634_v45 }
 0x20d   : > { %v596_v27 = vrot.slane %v1259_v39, %v1622_v52  ;;  %v526_v39 = vsel %vm524_vm4, %v1597_v31, %v1599_v32 }
 0x20e   : > { %1047 = vmatprep.subr.mxu1 %v714_v2  ;;  %v1640_v10 = vpop.permute.xlu1 %818 }
 0x20f   : > { %1048 = vmatpush1.msra.mxu1 %v713_v4  ;;  %v655_v4 = vmul.f32 %v646_v35, %v637_v54 }
 0x210   : > { %v622_v18 = vpop.permute.xlu0 %621  ;;  %1049 = vmatprep.subr.mxu1 %v712_v9  ;;  %v653_v9 = vmul.f32 %v646_v35, %v1557_v12 }
 0x211   : > { %1050 = vmatpush1.msra.mxu1 %v711_v14 }
 0x212   : > { %1051 = vmatprep.subr.mxu1 %v710_v17  ;;  %v630_v26 = vpop.permute.xlu1 %629 }
 0x213   : > { %v635_v50 = vsel %vm631_vm2, %v622_v18, %v630_v26  ;;  %v639_v53 = vsel %vm631_vm2, %v630_v26, %v622_v18  ;;  %1052 = vmatpush1.msra.mxu1 %v709_v21 }
 0x214   : > { %v659_v55 = vmul.f32 %v646_v35, %v639_v53  ;;  %v660_v58 = vmul.f32 %v650_v25, %v635_v50  ;;  %v568_v59 = vpop.permute.xlu0 %567  ;;  %1053 = vmatprep.subr.mxu1 %v708_v22  ;;  %v579_v22 = vsel %vm577_vm3, %v1593_v29, %v1595_v30  ;;  %v583_v35 = vsel %vm577_vm3, %v1595_v30, %v1593_v29 }
 0x215   : > { %1054 = vmatpush1.msra.mxu1 %v707_v37  ;;  %v604_v25 = vmul.f32 %v596_v27, %v580_v13  ;;  %v602_v37 = vmul.f32 %v596_v27, %v579_v22  ;;  %v601_v50 = vmul.f32 %v592_v6, %v583_v35  ;;  %v600_v53 = vmul.f32 %v596_v27, %v1564_v15 }
 0x216   : > { %1055 = vmatprep.subr.mxu1 %v660_v58  ;;  %v1665_v61 = vpop.permute.xlu1 %816  ;;  %v538_v29 = vrot.slane %v533_v41, %v1620_v51  ;;  %v542_v30 = vrot.slane %v533_v41, %v1622_v52  ;;  %v527_v58 = vsel %vm524_vm4, %v1609_v43, %v1611_v44  ;;  %v531_v15 = vsel %vm524_vm4, %v1611_v44, %v1609_v43  ;;  %v1265_v43 = vld [vmem:[%s1869_s7 + $0xe] sm:$0x3] }
 0x217   : > { %1056 = vmatpush1.msra.mxu1 %v659_v55  ;;  %v599_v55 = vmul.f32 %v592_v6, %v1568_v16  ;;  %v883_v13 = vsel %vm876_vm5, %v1615_v47, %v1613_v46 }
 0x218   : > { %v513_v2 = vpop.permute.xlu0 %512  ;;  %1057 = vmatprep.subr.mxu1 %v658_v60  ;;  %v549_v44 = vmul.f32 %v538_v29, %v531_v15 }
 0x219   : > { %1058 = vmatpush1.msra.mxu1 %v657_v40  ;;  %v530_v40 = vsel %vm524_vm4, %v1599_v32, %v1597_v31  ;;  %v895_v31 = vrot.slane %v1265_v43, %v1622_v52 }
 0x21a   : > { %1059 = vmatprep.subr.mxu1 %v656_v62  ;;  %v576_v28 = vpop.permute.xlu1 %575  ;;  %v550_v62 = vmul.f32 %v542_v30, %v527_v58 }
 0x21b   : > { %v581_v14 = vsel %vm577_vm3, %v568_v59, %v576_v28  ;;  %v585_v17 = vsel %vm577_vm3, %v576_v28, %v568_v59  ;;  %1060 = vmatpush1.msra.mxu1 %v655_v4  ;;  %v548_v4 = vmul.f32 %v542_v30, %v526_v39  ;;  %v891_v28 = vrot.slane %v1265_v43, %v1620_v51 }
 0x21c   : > { %v605_v18 = vmul.f32 %v592_v6, %v585_v17  ;;  %v606_v21 = vmul.f32 %v596_v27, %v581_v14  ;;  %v867_v12 = vpop.permute.xlu0 %866  ;;  %1061 = vmatprep.subr.mxu1 %v654_v5  ;;  %v547_v6 = vmul.f32 %v538_v29, %v530_v40  ;;  %v546_v27 = vmul.f32 %v542_v30, %v1574_v19 }
 0x21d   : > { %1062 = vmatpush1.msra.mxu1 %v653_v9  ;;  %v545_v9 = vmul.f32 %v538_v29, %v1578_v20  ;;  %v879_v19 = vsel %vm876_vm5, %v1613_v46, %v1615_v47  ;;  %v903_v22 = vmul.f32 %v895_v31, %v883_v13  ;;  %v1264_v46 = vld [vmem:[%s1869_s7 + $0xc] sm:$0x3] }
 0x21e   : > { %1063 = vmatprep.subr.mxu1 %v606_v21  ;;  %v1694_v26 = vpop.permute.xlu1 %814  ;;  %v882_v21 = vsel %vm876_vm5, %v1603_v34, %v1601_v33 }
 0x21f   : > { %1064 = vmatpush1.msra.mxu1 %v605_v18  ;;  %v901_v47 = vmul.f32 %v895_v31, %v882_v21 }
 0x220   : > { %v1699_v45 = vpop.permute.xlu0 %812  ;;  %1065 = vmatprep.subr.mxu1 %v604_v25  ;;  %v902_v25 = vmul.f32 %v891_v28, %v879_v19  ;;  %v1262_v19 = vld [vmem:[%s1869_s7 + $0x8] sm:$0x3] }
 0x221   : > { %1066 = vmatpush1.msra.mxu1 %v603_v42 }
 0x222   : > { %1067 = vmatprep.subr.mxu1 %v602_v37  ;;  %v521_v7 = vpop.permute.xlu1 %520  ;;  %v899_v37 = vmul.f32 %v895_v31, %v1587_v24 }
 0x223   : > { %v528_v59 = vsel %vm524_vm4, %v513_v2, %v521_v7  ;;  %v532_v8 = vsel %vm524_vm4, %v521_v7, %v513_v2  ;;  %1068 = vmatpush1.msra.mxu1 %v601_v50  ;;  %v825_v7 = vsel %vm822_vm6, %v1634_v63, %v1640_v10 }
 0x224   : > { %v551_v54 = vmul.f32 %v538_v29, %v532_v8  ;;  %v552_v60 = vmul.f32 %v542_v30, %v528_v59  ;;  %v1717_v16 = vpop.permute.xlu0 %808  ;;  %1069 = vmatprep.subr.mxu1 %v600_v53  ;;  %v898_v53 = vmul.f32 %v891_v28, %v1583_v23  ;;  %v829_v29 = vsel %vm822_vm6, %v1640_v10, %v1634_v63  ;;  %v1263_v10 = vld [vmem:[%s1869_s7 + $0xa] sm:$0x3] }
 0x225   : > { %1070 = vmatpush1.msra.mxu1 %v599_v55  ;;  %v828_v59 = vsel %vm822_vm6, %v1665_v61, %v1717_v16  ;;  %v787_v43 = vrot.slane %v1263_v10, %v1622_v52 }
 0x226   : > { %1071 = vmatprep.subr.mxu1 %v552_v60  ;;  %v1727_v2 = vpop.permute.xlu1 %764 }
 0x227   : > { %1072 = vmatpush1.msra.mxu1 %v551_v54 }
 0x228   : > { %v807_v5 = vpop.permute.xlu0 %806  ;;  %1073 = vmatprep.subr.mxu1 %v550_v62  ;;  %v783_v62 = vrot.slane %v1263_v10, %v1620_v51 }
 0x229   : > { %1074 = vmatpush1.msra.mxu1 %v549_v44  ;;  %v827_v63 = vsel %vm822_vm6, %v1694_v26, %v807_v5  ;;  %v823_v39 = vsel %vm822_vm6, %v807_v5, %v1694_v26 }
 0x22a   : > { %1075 = vmatprep.subr.mxu1 %v548_v4  ;;  %v875_v32 = vpop.permute.xlu1 %874 }
 0x22b   : > { %v880_v14 = vsel %vm876_vm5, %v867_v12, %v875_v32  ;;  %v884_v17 = vsel %vm876_vm5, %v875_v32, %v867_v12  ;;  %1076 = vmatpush1.msra.mxu1 %v547_v6  ;;  %v878_v12 = vsel %vm876_vm5, %v1601_v33, %v1603_v34  ;;  %v837_v33 = vrot.slane %v1264_v46, %v1620_v51 }
 0x22c   : > { %v904_v11 = vmul.f32 %v891_v28, %v880_v14  ;;  %v905_v18 = vmul.f32 %v895_v31, %v884_v17  ;;  %v759_v20 = vpop.permute.xlu0 %758  ;;  %1077 = vmatprep.subr.mxu1 %v546_v27  ;;  %v900_v42 = vmul.f32 %v891_v28, %v878_v12  ;;  %v841_v34 = vrot.slane %v1264_v46, %v1622_v52 }
 0x22d   : > { %1078 = vmatpush1.msra.mxu1 %v545_v9  ;;  %v848_v54 = vmul.f32 %v837_v33, %v825_v7  ;;  %v844_v4 = vmul.f32 %v837_v33, %v823_v39 }
 0x22e   : > { %1079 = vmatprep.subr.mxu1 %v905_v18  ;;  %v763_v35 = vpop.permute.xlu1 %762  ;;  %v849_v8 = vmul.f32 %v841_v34, %v829_v29  ;;  %v847_v60 = vmul.f32 %v841_v34, %v828_v59  ;;  %v845_v40 = vmul.f32 %v841_v34, %v827_v63  ;;  %v1266_v18 = vld [vmem:[%s1869_s7 + $0x10] sm:$0x3] }
 0x22f   : > { %1080 = vmatpush2.msra.mxu1 %v904_v11  ;;  %v945_v46 = vrot.slane %v1266_v18, %v1620_v51 }
 0x230   : > { %v757_v41 = vpop.permute.xlu0 %756  ;;  %1081 = vmatprep.subr.mxu1 %v903_v22 }
 0x231   : > { %1082 = vmatpush2.msra.mxu1 %v902_v25  ;;  %v775_v6 = vsel %vm768_vm7, %v1727_v2, %v757_v41  ;;  %v771_v27 = vsel %vm768_vm7, %v757_v41, %v1727_v2 }
 0x232   : > { %1083 = vmatprep.subr.mxu1 %v901_v47  ;;  %v821_v50 = vpop.permute.xlu1 %820  ;;  %v795_v13 = vmul.f32 %v787_v43, %v775_v6  ;;  %v794_v11 = vmul.f32 %v783_v62, %v771_v27  ;;  %v949_v47 = vrot.slane %v1266_v18, %v1622_v52 }
 0x233   : > { %v826_v30 = vsel %vm822_vm6, %v1699_v45, %v821_v50  ;;  %v830_v24 = vsel %vm822_vm6, %v821_v50, %v1699_v45  ;;  %1084 = vmatpush2.msra.mxu1 %v900_v42  ;;  %v824_v45 = vsel %vm822_vm6, %v1717_v16, %v1665_v61  ;;  %v733_v42 = vrot.slane %v1262_v19, %v1622_v52 }
 0x234   : > { %v850_v23 = vmul.f32 %v837_v33, %v826_v30  ;;  %v851_v55 = vmul.f32 %v841_v34, %v830_v24  ;;  %v755_v58 = vpop.permute.xlu0 %754  ;;  %1085 = vmatprep.subr.mxu1 %v899_v37  ;;  %v846_v16 = vmul.f32 %v837_v33, %v824_v45 }
 0x235   : > { %1086 = vmatpush2.msra.mxu1 %v898_v53  ;;  %v774_v9 = vsel %vm768_vm7, %v763_v35, %v755_v58  ;;  %v770_v14 = vsel %vm768_vm7, %v755_v58, %v763_v35  ;;  %v729_v35 = vrot.slane %v1262_v19, %v1620_v51  ;;  %v743_v52 = vmul.f32 %v733_v42, %v1493_v1 }
 0x236   : > { %1087 = vmatprep.subr.mxu1 %v851_v55  ;;  %v761_v15 = vpop.permute.xlu1 %760  ;;  %v792_v22 = vmul.f32 %v783_v62, %v770_v14  ;;  %v741_v55 = vmul.f32 %v733_v42, %v1467_v57  ;;  %v737_v63 = vmul.f32 %v733_v42, %v1419_v38  ;;  %v970_v38 = vld [vmem:[%s1868_s6 + $0x10] sm:$0xff] }
 0x237   : > { %1088 = vmatpush2.msra.mxu1 %v850_v23  ;;  %v742_v24 = vmul.f32 %v729_v35, %v1489_v0  ;;  %v740_v58 = vmul.f32 %v729_v35, %v1463_v56  ;;  %v739_v0 = vmul.f32 %v733_v42, %v1443_v49  ;;  %v738_v57 = vmul.f32 %v729_v35, %v1439_v48  ;;  %v968_v48 = vld [vmem:[%s1868_s6] sm:$0xff] }
 0x238   : > { %v753_v61 = vpop.permute.xlu0 %752  ;;  %1089 = vmatprep.subr.mxu1 %v849_v8  ;;  %v736_v49 = vmul.f32 %v729_v35, %v1417_v36 }
 0x239   : > { %1090 = vmatpush2.msra.mxu1 %v848_v54  ;;  %v773_v2 = vsel %vm768_vm7, %v761_v15, %v753_v61  ;;  %v769_v21 = vsel %vm768_vm7, %v753_v61, %v761_v15 }
 0x23a   : > { %1091 = vmatprep.subr.mxu1 %v847_v60  ;;  %v767_v44 = vpop.permute.xlu1 %766  ;;  %v791_v25 = vmul.f32 %v787_v43, %v773_v2  ;;  %v790_v37 = vmul.f32 %v783_v62, %v769_v21 }
 0x23b   : > { %v772_v26 = vsel %vm768_vm7, %v759_v20, %v767_v44  ;;  %v776_v5 = vsel %vm768_vm7, %v767_v44, %v759_v20  ;;  %1092 = vmatpush2.msra.mxu1 %v846_v16  ;;  %v793_v20 = vmul.f32 %v787_v43, %v774_v9 }
 0x23c   : > { %v796_v28 = vmul.f32 %v783_v62, %v772_v26  ;;  %v797_v31 = vmul.f32 %v787_v43, %v776_v5  ;;  %v921_v32 = vpop.permute.xlu0 %920  ;;  %1093 = vmatprep.subr.mxu1 %v845_v40 }
 0x23d   : > { %1094 = vmatpush2.msra.mxu1 %v844_v4 }
 0x23e   : > { %1095 = vmatprep.subr.mxu1 %v797_v31  ;;  %v927_v17 = vpop.permute.xlu1 %926 }
 0x23f   : > { %1096 = vmatpush2.msra.mxu1 %v796_v28 }
 0x240   : > { %v919_v12 = vpop.permute.xlu0 %918  ;;  %1097 = vmatprep.subr.mxu1 %v795_v13 }
 0x241   : > { %1098 = vmatpush2.msra.mxu1 %v794_v11  ;;  %v937_v33 = vsel %vm930_vm8, %v927_v17, %v919_v12  ;;  %v933_v51 = vsel %vm930_vm8, %v919_v12, %v927_v17 }
 0x242   : > { %1099 = vmatprep.subr.mxu1 %v793_v20  ;;  %v929_v41 = vpop.permute.xlu1 %928  ;;  %v957_v7 = vmul.f32 %v949_v47, %v937_v33  ;;  %v956_v59 = vmul.f32 %v945_v46, %v933_v51 }
 0x243   : > { %v934_v34 = vsel %vm930_vm8, %v921_v32, %v929_v41  ;;  %v938_v50 = vsel %vm930_vm8, %v929_v41, %v921_v32  ;;  %1100 = vmatpush2.msra.mxu1 %v792_v22 }
 0x244   : > { %v958_v53 = vmul.f32 %v945_v46, %v934_v34  ;;  %v959_v29 = vmul.f32 %v949_v47, %v938_v50  ;;  %v917_v30 = vpop.permute.xlu0 %916  ;;  %1101 = vmatprep.subr.mxu1 %v791_v25 }
 0x245   : > { %1102 = vmatpush2.msra.mxu1 %v790_v37 }
 0x246   : > { %1142 = vmatprep.subr.mxu0 %v959_v29  ;;  %v925_v23 = vpop.permute.xlu1 %924  ;;  %1103 = vmatprep.subr.mxu1 %v743_v52 }
 0x247   : > { %v932_v8 = vsel %vm930_vm8, %v917_v30, %v925_v23  ;;  %v936_v45 = vsel %vm930_vm8, %v925_v23, %v917_v30  ;;  %1104 = vmatpush2.msra.mxu1 %v742_v24  ;;  %1143 = vmatpush1.msra.mxu0 %v958_v53 }
 0x248   : > { %v954_v1 = vmul.f32 %v945_v46, %v932_v8  ;;  %v955_v15 = vmul.f32 %v949_v47, %v936_v45  ;;  %1105 = vmatprep.subr.mxu1 %v741_v55  ;;  %1144 = vmatprep.subr.mxu0 %v957_v7  ;;  %v915_v56 = vpop.permute.xlu0 %914 }
 0x249   : > { %1106 = vmatpush2.msra.mxu1 %v740_v58  ;;  %1145 = vmatpush1.msra.mxu0 %v956_v59 }
 0x24a   : > { %1146 = vmatprep.subr.mxu0 %v955_v15  ;;  %v923_v54 = vpop.permute.xlu1 %922  ;;  %1107 = vmatprep.subr.mxu1 %v739_v0 }
 0x24b   : > { %v931_v10 = vsel %vm930_vm8, %v915_v56, %v923_v54  ;;  %v935_v60 = vsel %vm930_vm8, %v923_v54, %v915_v56  ;;  %1108 = vmatpush2.msra.mxu1 %v738_v57  ;;  %1147 = vmatpush1.msra.mxu0 %v954_v1 }
 0x24c   : > { %v952_v39 = vmul.f32 %v945_v46, %v931_v10  ;;  %v953_v61 = vmul.f32 %v949_v47, %v935_v60  ;;  %1109 = vmatprep.subr.mxu1 %v737_v63 }
 0x24d   : > { %1110 = vmatpush2.msra.mxu1 %v736_v49 }
 0x24e   : > { %1148 = vmatprep.subr.mxu0 %v953_v61  ;;  %1112 = vmatmul.mubr.f32.vlgmr.msra.gmra.mxu1 %v968_v48 }
 0x24f   : > { %1149 = vmatpush1.msra.mxu0 %v952_v39 }
 0x250   : > { %1267 = vmatmul.mubr.msk.f32.vlgmr.msra.gmra.mxu0 %vm1043_vm9, %v970_v38 }
 0x30e   : > { %v1113_v36 = vpop.f32.mrf.mxu1 }
 0x310   : > { %v1184_v3 = vpop.f32.mrf.mxu0  ;;  %v1115_v40 = vpop.f32.mrf.mxu1 }
 0x311   : > { %v1185_v16 = vadd.f32 %v1184_v3, %v1113_v36 }
 0x312   : > { %v1186_v62 = vpop.f32.mrf.mxu0 }
 0x313   : > { %1189 = vst [vmem:[%s1375_s18 + $0x10] sm:$0xff] %v1185_v16  ;;  %v1187_v43 = vadd.f32 %v1186_v62, %v1115_v40 }
 0x315   : > { %1190 = vst [vmem:[%s1375_s18 + $0x18] sm:$0xff] %v1187_v43 }
 0x316 PF: > { %s18_s27 = sadd.s32 1, %s1298_s27  }
 0x317   : > { %p15_p4 = scmp.ge.s32.totalorder %s18_s27, 4  }
 0x319   :  { %17 = sbr.rel (!%p15_p4) target bundleno = 1 (0x1), region = 90 }

</bundles_post_ra>
